<compile_context>
chip_gen: v5e
topology: v5e:2x2
jax: 0.10.0
libtpu: 0.0.40
codegen_flags: <defaults>
</compile_context>

<pallas_src>
import jax
import jax.numpy as jnp
from jax.experimental import pallas as pl
from jax.experimental.pallas import tpu as pltpu


# ------------------------------ helpers ------------------------------------ #
def _round_up(x, m):
    return (x + m - 1) // m * m


def _pad2(a, rows, cols):
    r, c = a.shape
    return jnp.pad(a, ((0, rows - r), (0, cols - c)))


def _pick_tiles(n):
    """Row tile TM and reduction tile TK (TM divides TK, TK | n_pad)."""
    if n >= 8192:
        tk = 2048
    elif n >= 2048:
        tk = 1024
    elif n >= 512:
        tk = 512
    elif n >= 256:
        tk = 256
    else:
        tk = 128
    tm = min(tk, 512)
    return tm, tk


# ----------------------------- Pallas kernel ------------------------------- #
def sage_conv_kernel(a_ref, x_ref, wl_ref, wr_ref, bl_ref, invd_ref,
                     o_ref, acc_ref):
    """One SAGEConv layer, tiled over (row block i, reduction block k).

    a_ref   : [TM, TK]            int8 unnormalized 0/1 adjacency tile
    x_ref   : [N_pad, Din_pad]    bf16 features, RESIDENT (constant index_map)
    wl_ref  : [Din_pad, Dout_pad] bf16 neighbor-branch weight
    wr_ref  : [Din_pad, Dout_pad] bf16 root-branch weight
    bl_ref  : [1, Dout_pad]       f32 neighbor-branch bias
    invd_ref: [TM, 1]             f32 per-row 1/deg (exact mean normalization)
    o_ref   : [TM, Dout_pad]      output tile (bf16 for layer 1, f32 for layer 2)
    acc_ref : [TM, Din_pad]       f32 accumulator for sum_j A[i,j] * x[j]
    """
    i = pl.program_id(0)
    k = pl.program_id(1)
    tm, tk = a_ref.shape

    @pl.when(k == 0)
    def _init():
        acc_ref[...] = jnp.zeros_like(acc_ref)

    # Slice the k-th reduction chunk out of the resident X (no HBM re-stream).
    start_k = pl.multiple_of(k * tk, tk)
    xk = x_ref[pl.ds(start_k, tk), :]
    # int8 -> f32 -> bf16 upcast (VPU work, hidden under the A DMA).
    a_bf16 = a_ref[...].astype(jnp.float32).astype(jnp.bfloat16)
    acc_ref[...] += jnp.dot(a_bf16, xk, preferred_element_type=jnp.float32)

    @pl.when(k == pl.num_programs(1) - 1)
    def _finalize():
        start_i = pl.multiple_of(i * tm, tm)
        xi = x_ref[pl.ds(start_i, tm), :]
        # Exact f32 mean normalization, then project once per row block.
        agg = acc_ref[...] * invd_ref[...]
        agg = jnp.dot(agg.astype(jnp.bfloat16), wl_ref[...],
                      preferred_element_type=jnp.float32)
        root = jnp.dot(xi, wr_ref[...], preferred_element_type=jnp.float32)
        o_ref[...] = (agg + root + bl_ref[...]).astype(o_ref.dtype)


def sage_conv(a_i8, x_bf16, w_l, w_r, b_l, inv_deg, *, tm, tk, out_dtype):
    """One SAGEConv layer as a tiled pallas_call (all inputs pre-padded)."""
    n_pad = a_i8.shape[0]
    d_in = x_bf16.shape[1]
    d_out = w_l.shape[1]
    out_itemsize = jnp.dtype(out_dtype).itemsize

    flops = int(2 * n_pad * n_pad * d_in + 4 * n_pad * d_in * d_out)
    bytes_accessed = int(
        n_pad * n_pad * 1            # int8 adjacency stream
        + n_pad * d_in * 2           # resident X (fetched once)
        + 2 * d_in * d_out * 2       # Wl + Wr
        + d_out * 4 + n_pad * 4      # bias + inv_deg
        + n_pad * d_out * out_itemsize)

    # Conservative VMEM estimate (double-buffered inputs) + headroom,
    # capped at 64 MiB so the same budget fits v7x as well as v5e/v6e.
    vmem_bytes = (
        2 * tm * tk                      # A tiles (int8)
        + 2 * n_pad * d_in * 2           # resident X
        + 2 * 2 * d_in * d_out * 2       # Wl + Wr
        + 2 * d_out * 4                  # bias
        + 2 * tm * 128 * 4               # inv_deg (lane-padded)
        + 2 * tm * d_out * out_itemsize  # output tiles
        + tm * d_in * 4)                 # f32 accumulator scratch
    vmem_limit = int(min(max(2 * vmem_bytes + (4 << 20), 16 << 20), 64 << 20))

    return pl.pallas_call(
        sage_conv_kernel,
        out_shape=jax.ShapeDtypeStruct((n_pad, d_out), out_dtype),
        grid_spec=pltpu.PrefetchScalarGridSpec(
            num_scalar_prefetch=0,
            grid=(n_pad // tm, n_pad // tk),
            in_specs=[
                pl.BlockSpec((tm, tk), lambda i, k: (i, k)),        # A tile
                pl.BlockSpec((n_pad, d_in), lambda i, k: (0, 0)),   # X resident
                pl.BlockSpec((d_in, d_out), lambda i, k: (0, 0)),   # Wl
                pl.BlockSpec((d_in, d_out), lambda i, k: (0, 0)),   # Wr
                pl.BlockSpec((1, d_out), lambda i, k: (0, 0)),      # bias
                pl.BlockSpec((tm, 1), lambda i, k: (i, 0)),         # 1/deg
            ],
            out_specs=pl.BlockSpec((tm, d_out), lambda i, k: (i, 0)),
            scratch_shapes=[pltpu.VMEM((tm, d_in), jnp.float32)],
        ),
        compiler_params=pltpu.CompilerParams(
            dimension_semantics=("parallel", "arbitrary"),
            vmem_limit_bytes=vmem_limit),
        cost_estimate=pl.CostEstimate(
            flops=flops, transcendentals=0, bytes_accessed=bytes_accessed),
    )(a_i8, x_bf16, w_l, w_r, b_l, inv_deg)


# ------------------------------- glue (JAX) --------------------------------- #
def build_adj_and_invdeg(edge_index, num_nodes, n_pad):
    """Unnormalized 0/1 adjacency in int8 (A[i,j]=#edges j->i) + f32 1/deg."""
    src = edge_index[0]
    dst = edge_index[1]
    a = jnp.zeros((n_pad, n_pad), jnp.int8)
    a = a.at[dst, src].add(jnp.ones(src.shape, jnp.int8))
    # O(E) degree computation (no dense f32 N^2 pass).
    deg = jnp.zeros((n_pad,), jnp.float32).at[dst].add(1.0)
    inv_deg = (1.0 / jnp.maximum(deg, 1.0)).reshape(n_pad, 1)
    return a, inv_deg


def init_linear(key, fan_in, fan_out, bias):
    """Deterministic uniform(-1/sqrt(fan_in), 1/sqrt(fan_in)) init (PyTorch-style)."""
    kw, kb = jax.random.split(key)
    bound = 1.0 / jnp.sqrt(jnp.float32(fan_in))
    w = jax.random.uniform(kw, (fan_in, fan_out), jnp.float32, -bound, bound)
    b = (
        jax.random.uniform(kb, (1, fan_out), jnp.float32, -bound, bound)
        if bias
        else jnp.zeros((1, fan_out), jnp.float32)
    )
    return w, b


def sage_forward(x, edge_index, num_nodes, params):
    """Full Sage.forward: returns (out, hid)."""
    n = num_nodes
    in_dim = x.shape[1]
    hid_dim = params["wl1"].shape[1]
    out_dim = params["wl2"].shape[1]

    tm, tk = _pick_tiles(n)
    n_pad = _round_up(n, tk)
    din_p = _round_up(in_dim, 128)
    dhid_p = _round_up(hid_dim, 128)
    dout_p = _round_up(out_dim, 128)

    # 1-byte binary adjacency + exact f32 inverse degrees, built in O(N^2 int8 + E).
    a_i8, inv_deg = build_adj_and_invdeg(edge_index, n, n_pad)

    x_p = _pad2(x, n_pad, din_p).astype(jnp.bfloat16)
    wl1 = _pad2(params["wl1"], din_p, dhid_p).astype(jnp.bfloat16)
    wr1 = _pad2(params["wr1"], din_p, dhid_p).astype(jnp.bfloat16)
    bl1 = _pad2(params["bl1"], 1, dhid_p).astype(jnp.float32)
    wl2 = _pad2(params["wl2"], dhid_p, dout_p).astype(jnp.bfloat16)
    wr2 = _pad2(params["wr2"], dhid_p, dout_p).astype(jnp.bfloat16)
    bl2 = _pad2(params["bl2"], 1, dout_p).astype(jnp.float32)

    # Layer 1: hid emitted in bf16 so it feeds layer 2 with no extra cast pass.
    hid_p = sage_conv(a_i8, x_p, wl1, wr1, bl1, inv_deg,
                      tm=tm, tk=tk, out_dtype=jnp.bfloat16)
    # Layer 2: final output in f32.
    out_p = sage_conv(a_i8, hid_p, wl2, wr2, bl2, inv_deg,
                      tm=tm, tk=tk, out_dtype=jnp.float32)

    return out_p[:n, :out_dim], hid_p[:n, :hid_dim].astype(jnp.float32)


def sage_forward_ref(x, edge_index, num_nodes, params):
    """Pure-JAX f32 reference for correctness checking."""
    src, dst = edge_index[0], edge_index[1]
    a = jnp.zeros((num_nodes, num_nodes), jnp.float32).at[dst, src].add(1.0)
    a = a / jnp.maximum(a.sum(axis=1, keepdims=True), 1.0)

    def conv(h, wl, wr, bl):
        return (a @ h) @ wl + h @ wr + bl

    hid = conv(x, params["wl1"], params["wr1"], params["bl1"])
    out = conv(hid, params["wl2"], params["wr2"], params["bl2"])
    return out, hid


if __name__ == "__main__":
    key = jax.random.PRNGKey(0)
    k_x, k1l, k1r, k2l, k2r = jax.random.split(key, 5)

    # small synthetic graph: bidirectional ring over N nodes
    N, IN_DIM, HID_DIM, OUT_DIM = 16, 8, 16, 4
    idx = jnp.arange(N, dtype=jnp.int32)
    src = jnp.concatenate([idx, (idx + 1) % N])
    dst = jnp.concatenate([(idx + 1) % N, idx])
    edge_index = jnp.stack([src, dst])          # [2, E], E = 2N

    x = jax.random.normal(k_x, (N, IN_DIM), jnp.float32)

    wl1, bl1 = init_linear(k1l, IN_DIM, HID_DIM, bias=True)    # SAGEConv.lin_l
    wr1, _   = init_linear(k1r, IN_DIM, HID_DIM, bias=False)   # SAGEConv.lin_r
    wl2, bl2 = init_linear(k2l, HID_DIM, OUT_DIM, bias=True)
    wr2, _   = init_linear(k2r, HID_DIM, OUT_DIM, bias=False)
    params = dict(wl1=wl1, bl1=bl1, wr1=wr1, wl2=wl2, bl2=bl2, wr2=wr2)

    out, hid = jax.block_until_ready(sage_forward(x, edge_index, N, params))
    out_ref, hid_ref = sage_forward_ref(x, edge_index, N, params)

    assert out.shape == (N, OUT_DIM) and hid.shape == (N, HID_DIM)
    # bf16 operands with f32 accumulation -> compare against f32 reference
    # with a tolerance that covers bf16 input rounding (~0.4% relative).
    assert jnp.allclose(out, out_ref, atol=5e-2, rtol=5e-2)
    assert jnp.allclose(hid, hid_ref, atol=5e-2, rtol=5e-2)

    print("KERNEL_OK")
</pallas_src>

<mosaic_0001>
module attributes {stable_mosaic.version = 11 : i64} {
  func.func @sage_conv_kernel(%arg0: i32, %arg1: i32, %arg2: memref<128x128xi8, #tpu.memory_space<vmem>>, %arg3: memref<128x128xbf16, #tpu.memory_space<vmem>>, %arg4: memref<128x128xbf16, #tpu.memory_space<vmem>>, %arg5: memref<128x128xbf16, #tpu.memory_space<vmem>>, %arg6: memref<1x128xf32, #tpu.memory_space<vmem>>, %arg7: memref<128x1xf32, #tpu.memory_space<vmem>>, %arg8: memref<128x128xbf16, #tpu.memory_space<vmem>>, %arg9: memref<128x128xf32, #tpu.memory_space<vmem>>) attributes {dimension_semantics = [#tpu.dimension_semantics<parallel>, #tpu.dimension_semantics<arbitrary>], iteration_bounds = array<i64: 1, 1>, scalar_prefetch = 0 : i64, scratch_operands = 1 : i64, tpu.core_type = #tpu.core_type<tc>, window_params = [{transform_indices = @transform_0, window_bounds = array<i64: 128, 128>}, {pipeline_mode = #tpu.pipeline_mode<synchronous>, transform_indices = @transform_1, window_bounds = array<i64: 128, 128>}, {pipeline_mode = #tpu.pipeline_mode<synchronous>, transform_indices = @transform_2, window_bounds = array<i64: 128, 128>}, {pipeline_mode = #tpu.pipeline_mode<synchronous>, transform_indices = @transform_3, window_bounds = array<i64: 128, 128>}, {pipeline_mode = #tpu.pipeline_mode<synchronous>, transform_indices = @transform_4, window_bounds = array<i64: 1, 128>}, {transform_indices = @transform_5, window_bounds = array<i64: 128, 1>}, {transform_indices = @transform_6, window_bounds = array<i64: 128, 128>}]} {
    %c0_i32 = arith.constant 0 : i32
    %0 = arith.cmpi eq, %arg1, %c0_i32 : i32
    %1 = arith.extui %0 : i1 to i32
    %c0_i32_0 = arith.constant 0 : i32
    %2 = arith.cmpi ne, %1, %c0_i32_0 : i32
    scf.if %2 {
      %cst_9 = arith.constant 0.000000e+00 : f32
      %17 = vector.broadcast %cst_9 : f32 to vector<128x128xf32>
      %c0_10 = arith.constant 0 : index
      %c0_11 = arith.constant 0 : index
      %18 = vector.load %arg9[%c0_10, %c0_11] : memref<128x128xf32, #tpu.memory_space<vmem>>, vector<128x128xf32>
      tpu.vector_store %arg9[%c0_10, %c0_11], %17 {strides = array<i32>} : memref<128x128xf32, #tpu.memory_space<vmem>>, vector<128x128xf32>,
    } else {
    }
    %c128_i32 = arith.constant 128 : i32
    %3 = arith.muli %arg1, %c128_i32 : i32
    %4 = tpu.assume_multiple %3, 128 : i32
    %5 = arith.index_cast %4 : i32 to index
    %c0 = arith.constant 0 : index
    %6 = vector.load %arg3[%5, %c0] : memref<128x128xbf16, #tpu.memory_space<vmem>>, vector<128x128xbf16>
    %c0_1 = arith.constant 0 : index
    %c0_2 = arith.constant 0 : index
    %7 = vector.load %arg2[%c0_1, %c0_2] : memref<128x128xi8, #tpu.memory_space<vmem>>, vector<128x128xi8>
    %8 = arith.sitofp %7 : vector<128x128xi8> to vector<128x128xf32>
    %9 = arith.truncf %8 : vector<128x128xf32> to vector<128x128xbf16>
    %c0_3 = arith.constant 0 : index
    %c0_4 = arith.constant 0 : index
    %10 = vector.load %arg9[%c0_3, %c0_4] : memref<128x128xf32, #tpu.memory_space<vmem>>, vector<128x128xf32>
    %cst = arith.constant dense<0.000000e+00> : vector<128x128xf32>
    %11 = tpu.matmul %9, %6, %cst {dimension_numbers = #tpu.dot_dimension_numbers<[1], [0], [0], [1], [0, 0, 1, 1], [], []>} : vector<128x128xbf16>, vector<128x128xbf16>, vector<128x128xf32> -> vector<128x128xf32>
    %12 = arith.addf %10, %11 : vector<128x128xf32>
    %c0_5 = arith.constant 0 : index
    %c0_6 = arith.constant 0 : index
    %13 = vector.load %arg9[%c0_5, %c0_6] : memref<128x128xf32, #tpu.memory_space<vmem>>, vector<128x128xf32>
    tpu.vector_store %arg9[%c0_5, %c0_6], %12 {strides = array<i32>} : memref<128x128xf32, #tpu.memory_space<vmem>>, vector<128x128xf32>,
    %c0_i32_7 = arith.constant 0 : i32
    %14 = arith.cmpi eq, %arg1, %c0_i32_7 : i32
    %15 = arith.extui %14 : i1 to i32
    %c0_i32_8 = arith.constant 0 : i32
    %16 = arith.cmpi ne, %15, %c0_i32_8 : i32
    scf.if %16 {
      %c128_i32_9 = arith.constant 128 : i32
      %17 = arith.muli %arg0, %c128_i32_9 : i32
      %18 = tpu.assume_multiple %17, 128 : i32
      %19 = arith.index_cast %18 : i32 to index
      %c0_10 = arith.constant 0 : index
      %20 = vector.load %arg3[%19, %c0_10] : memref<128x128xbf16, #tpu.memory_space<vmem>>, vector<128x128xbf16>
      %c0_11 = arith.constant 0 : index
      %c0_12 = arith.constant 0 : index
      %21 = vector.load %arg9[%c0_11, %c0_12] : memref<128x128xf32, #tpu.memory_space<vmem>>, vector<128x128xf32>
      %c0_13 = arith.constant 0 : index
      %c0_14 = arith.constant 0 : index
      %22 = vector.load %arg7[%c0_13, %c0_14] : memref<128x1xf32, #tpu.memory_space<vmem>>, vector<128x1xf32>
      %23 = vector.broadcast %22 : vector<128x1xf32> to vector<128x128xf32>
      %24 = arith.mulf %21, %23 : vector<128x128xf32>
      %25 = arith.truncf %24 : vector<128x128xf32> to vector<128x128xbf16>
      %c0_15 = arith.constant 0 : index
      %c0_16 = arith.constant 0 : index
      %26 = vector.load %arg4[%c0_15, %c0_16] : memref<128x128xbf16, #tpu.memory_space<vmem>>, vector<128x128xbf16>
      %cst_17 = arith.constant dense<0.000000e+00> : vector<128x128xf32>
      %27 = tpu.matmul %25, %26, %cst_17 {dimension_numbers = #tpu.dot_dimension_numbers<[1], [0], [0], [1], [0, 0, 1, 1], [], []>} : vector<128x128xbf16>, vector<128x128xbf16>, vector<128x128xf32> -> vector<128x128xf32>
      %c0_18 = arith.constant 0 : index
      %c0_19 = arith.constant 0 : index
      %28 = vector.load %arg5[%c0_18, %c0_19] : memref<128x128xbf16, #tpu.memory_space<vmem>>, vector<128x128xbf16>
      %cst_20 = arith.constant dense<0.000000e+00> : vector<128x128xf32>
      %29 = tpu.matmul %20, %28, %cst_20 {dimension_numbers = #tpu.dot_dimension_numbers<[1], [0], [0], [1], [0, 0, 1, 1], [], []>} : vector<128x128xbf16>, vector<128x128xbf16>, vector<128x128xf32> -> vector<128x128xf32>
      %30 = arith.addf %27, %29 : vector<128x128xf32>
      %c0_21 = arith.constant 0 : index
      %c0_22 = arith.constant 0 : index
      %31 = vector.load %arg6[%c0_21, %c0_22] : memref<1x128xf32, #tpu.memory_space<vmem>>, vector<1x128xf32>
      %32 = vector.broadcast %31 : vector<1x128xf32> to vector<128x128xf32>
      %33 = arith.addf %30, %32 : vector<128x128xf32>
      %34 = arith.truncf %33 : vector<128x128xf32> to vector<128x128xbf16>
      %c0_23 = arith.constant 0 : index
      %c0_24 = arith.constant 0 : index
      %35 = vector.load %arg8[%c0_23, %c0_24] : memref<128x128xbf16, #tpu.memory_space<vmem>>, vector<128x128xbf16>
      tpu.vector_store %arg8[%c0_23, %c0_24], %34 {strides = array<i32>} : memref<128x128xbf16, #tpu.memory_space<vmem>>, vector<128x128xbf16>,
    } else {
    }
    return
  }
  func.func @transform_0(%arg0: i32, %arg1: i32) -> (i32, i32) {
    %c0_i32 = arith.constant 0 : i32
    return %arg0, %arg1 : i32, i32
  }
  func.func @transform_1(%arg0: i32, %arg1: i32) -> (i32, i32) {
    %c0_i32 = arith.constant 0 : i32
    %c0_i32_0 = arith.constant 0 : i32
    %c0_i32_1 = arith.constant 0 : i32
    return %c0_i32, %c0_i32_0 : i32, i32
  }
  func.func @transform_2(%arg0: i32, %arg1: i32) -> (i32, i32) {
    %c0_i32 = arith.constant 0 : i32
    %c0_i32_0 = arith.constant 0 : i32
    %c0_i32_1 = arith.constant 0 : i32
    return %c0_i32, %c0_i32_0 : i32, i32
  }
  func.func @transform_3(%arg0: i32, %arg1: i32) -> (i32, i32) {
    %c0_i32 = arith.constant 0 : i32
    %c0_i32_0 = arith.constant 0 : i32
    %c0_i32_1 = arith.constant 0 : i32
    return %c0_i32, %c0_i32_0 : i32, i32
  }
  func.func @transform_4(%arg0: i32, %arg1: i32) -> (i32, i32) {
    %c0_i32 = arith.constant 0 : i32
    %c0_i32_0 = arith.constant 0 : i32
    %c0_i32_1 = arith.constant 0 : i32
    return %c0_i32, %c0_i32_0 : i32, i32
  }
  func.func @transform_5(%arg0: i32, %arg1: i32) -> (i32, i32) {
    %c0_i32 = arith.constant 0 : i32
    %c0_i32_0 = arith.constant 0 : i32
    return %arg0, %c0_i32 : i32, i32
  }
  func.func @transform_6(%arg0: i32, %arg1: i32) -> (i32, i32) {
    %c0_i32 = arith.constant 0 : i32
    %c0_i32_0 = arith.constant 0 : i32
    return %arg0, %c0_i32 : i32, i32
  }
}

</mosaic_0001>

<bundles_post_ra>
// kernel: tpu_custom_call.1
= control target key start
LH: loop header
LB: loop body
LE: loop exit
PB: predicated region body
PF: predicated region fallthrough
CT: control target
= control target key end

     0   :  { %11 = vsyncpa [#allocation4], 0  ;;  %s1316_s0 = inlined_call_operand.hbm [shape: s8[128,128], index: 0, kind: input, shape index: {}]   ;;  %s1317_s1 = inlined_call_operand.vmem [shape: bf16[128,128], index: 1, kind: input, shape index: {}]   ;;  %s1318_s2 = inlined_call_operand.vmem [shape: bf16[128,128], index: 2, kind: input, shape index: {}]   ;;  %s1319_s3 = inlined_call_operand.hbm [shape: bf16[128,128], index: 3, kind: input, shape index: {}]   ;;  %s1320_s4 = inlined_call_operand.vmem [shape: f32[1,128], index: 4, kind: input, shape index: {}]   ;;  %s1321_s5 = inlined_call_operand.vmem [shape: f32[128,1], index: 5, kind: input, shape index: {}]   ;;  %s1322_s6 = inlined_call_operand.hbm [shape: bf16[128,128], index: 6, kind: output, shape index: {}]  }
   0x1   :  { %12 = vsyncpa [#allocation7], 0 }
   0x2   :  { %13 = vsyncpa [#allocation5], 0  ;;  %s18_s23 = sshll.u32 %s1316_s0, 4  ;;  %s1117_s24 = smov [#allocation3]   ;;  %s19_s23 = int_to_ptr.hbm [resolvable:$true] %s18_s23 }
   0x3   :  { %s20_s25 = sshll.u32 %s1117_s24, 4  ;;  %s35_s28 = sshll.u32 %s1319_s3, 4  ;;  %s21_s25 = int_to_ptr.vmem [resolvable:$true] %s20_s25  ;;  %s36_s28 = int_to_ptr.hbm [resolvable:$true] %s35_s28 }
   0x4   :  { %s1118_s29 = smov 128   ;;  %s1119_s30 = smov 8  }
   0x5   :  { %26 = dma.hbm_to_vmem [thread:$0]  %s19_s23, 512, %s21_s25, [#allocation4], %s1118_s29, %s1118_s29, %s1119_s30  }
   0x6   :  { %s1120_s7 = smov [#allocation6]   ;;  %s1121_s9 = smov 64  }
   0x7   :  { %s37_s8 = sshll.u32 %s1120_s7, 4  ;;  %s1122_s10 = smov 4   ;;  %s38_s8 = int_to_ptr.vmem [resolvable:$true] %s37_s8 }
   0x8   :  { %43 = dma.hbm_to_vmem [thread:$0]  %s36_s28, 1024, %s38_s8, [#allocation7], %s1121_s9, %s1121_s9, %s1122_s10  }
   0x9   :  { %1111 = dma.done.wait [#allocation4], 512  }
   0xa   :  { %1112 = vsyncadd [#allocation4], 4294966784 }
   0xb   :  { %1113 = dma.done.wait [#allocation7], 1024  }
   0xc   :  { %1114 = vsyncadd [#allocation7], 4294966272  ;;  %v1123_v0 = vmov 0   ;;  %v931_v1 = vld [vmem:[%s1317_s1 + $0x38] sm:$0xff]  ;;  %v326_v2 = vld [vmem:[%s1321_s5] sm:$0xff]  ;;  %s778_s18 = sshll.u32 %s1322_s6, 4  ;;  %s779_s18 = int_to_ptr.hbm [resolvable:$true] %s778_s18 }
   0xd   :  { %1035 = vset.pattern.permute.xlu0 %v1123_v0  ;;  %1036 = vset.pattern.permute.xlu1 %v1123_v0  ;;  %v930_v3 = vld [vmem:[%s1317_s1 + $0x30] sm:$0xff]  ;;  %v929_v5 = vld [vmem:[%s1317_s1 + $0x28] sm:$0xff]  ;;  %v329_v7 = vld [vmem:[%s1321_s5 + $0x18] sm:$0xff] }
   0xe   :  { %1037 = vset.pattern.permute.xlu2 %v1123_v0  ;;  %344 = vperm.xlu0 %1035, %v326_v2   ;;  %v328_v4 = vld [vmem:[%s1321_s5 + $0x10] sm:$0xff]  ;;  %v327_v6 = vld [vmem:[%s1321_s5 + $0x8] sm:$0xff]  ;;  %v928_v8 = vld [vmem:[%s1317_s1 + $0x20] sm:$0xff] }
   0xf   :  { %205 = vmatpush.bf16.msra.mxu0 %v931_v1  ;;  %1003 = vmatpush.bf16.msra.mxu3 %v931_v1  ;;  %v927_v9 = vld [vmem:[%s1317_s1 + $0x18] sm:$0xff]  ;;  %v332_v10 = vld [vmem:[%s1321_s5 + $0x30] sm:$0xff]  ;;  %v330_v12 = vld [vmem:[%s1321_s5 + $0x20] sm:$0xff] }
  0x10   :  { %354 = vperm.xlu1 %1036, %v328_v4   ;;  %v333_v11 = vld [vmem:[%s1321_s5 + $0x38] sm:$0xff]  ;;  %v926_v13 = vld [vmem:[%s1317_s1 + $0x10] sm:$0xff]  ;;  %v97_v14 = vld [vmem:[#allocation3] sm:$0xff]  ;;  %364 = vperm.xlu2 %1037, %v330_v12  }
  0x11   :  { %v100_v15 = vld [vmem:[#allocation3 + $0x18] sm:$0xff]  ;;  %v101_v16 = vunpack.c.0.s8 %v97_v14  ;;  %v102_v17 = vunpack.c.1.s8 %v97_v14  ;;  %v925_v20 = vld [vmem:[%s1317_s1 + $0x8] sm:$0xff]  ;;  %v338_v26 = vld [vmem:[%s1321_s5 + $0x60] sm:$0xff]  ;;  %v103_v33 = vunpack.c.2.s8 %v97_v14  ;;  %v104_v34 = vunpack.c.3.s8 %v97_v14 }
  0x12   :  { %v113_v18 = vunpack.c.0.s8 %v100_v15  ;;  %v114_v19 = vunpack.c.1.s8 %v100_v15  ;;  %v335_v21 = vld [vmem:[%s1321_s5 + $0x48] sm:$0xff]  ;;  %v924_v27 = vld [vmem:[%s1317_s1] sm:$0xff]  ;;  %v336_v30 = vld [vmem:[%s1321_s5 + $0x50] sm:$0xff]  ;;  %v115_v35 = vunpack.c.2.s8 %v100_v15  ;;  %v116_v36 = vunpack.c.3.s8 %v100_v15 }
  0x13   :  { %206 = vmatpush.bf16.msra.mxu0 %v930_v3  ;;  %1004 = vmatpush.bf16.msra.mxu3 %v930_v3  ;;  %v117_v22 = vcvt.s32.f32 %v101_v16  ;;  %v118_v23 = vcvt.s32.f32 %v102_v17  ;;  %v337_v31 = vld [vmem:[%s1321_s5 + $0x58] sm:$0xff]  ;;  %v331_v32 = vld [vmem:[%s1321_s5 + $0x28] sm:$0xff]  ;;  %v334_v38 = vld [vmem:[%s1321_s5 + $0x40] sm:$0xff]  ;;  %v119_v39 = vcvt.s32.f32 %v103_v33  ;;  %v120_v40 = vcvt.s32.f32 %v104_v34 }
  0x14   :  { %v129_v24 = vcvt.s32.f32 %v113_v18  ;;  %v130_v25 = vcvt.s32.f32 %v114_v19  ;;  %v341_v37 = vld [vmem:[%s1321_s5 + $0x78] sm:$0xff]  ;;  %v131_v41 = vcvt.s32.f32 %v115_v35  ;;  %v132_v42 = vcvt.s32.f32 %v116_v36  ;;  %v339_v45 = vld [vmem:[%s1321_s5 + $0x68] sm:$0xff]  ;;  %v340_v52 = vld [vmem:[%s1321_s5 + $0x70] sm:$0xff] }
  0x15   :  { %v133_v28 = vpack.c.bf16 %v118_v23, %v117_v22  ;;  %v134_v43 = vpack.c.bf16 %v120_v40, %v119_v39  ;;  %v98_v46 = vld [vmem:[#allocation3 + $0x8] sm:$0xff]  ;;  %v955_v58 = vld [vmem:[#allocation6 + $0x38] sm:$0xff]  ;;  %v99_v59 = vld [vmem:[#allocation3 + $0x10] sm:$0xff] }
  0x16   :  { %349 = vperm.xlu0 %1035, %v327_v6   ;;  %v139_v29 = vpack.c.bf16 %v130_v25, %v129_v24  ;;  %v140_v44 = vpack.c.bf16 %v132_v42, %v131_v41  ;;  %v105_v47 = vunpack.c.0.s8 %v98_v46  ;;  %v106_v48 = vunpack.c.1.s8 %v98_v46  ;;  %574 = vmatpush.bf16.msra.mxu1 %v955_v58  ;;  %v954_v60 = vld [vmem:[#allocation6 + $0x30] sm:$0xff]  ;;  %v953_v63 = vld [vmem:[#allocation6 + $0x28] sm:$0xff]  ;;  %v952_v2 = vld [vmem:[#allocation6 + $0x20] sm:$0xff] }
  0x17   :  { %207 = vmatpush.bf16.msra.mxu0 %v929_v5  ;;  %1005 = vmatpush.bf16.msra.mxu3 %v929_v5  ;;  %v107_v53 = vunpack.c.2.s8 %v98_v46  ;;  %v108_v54 = vunpack.c.3.s8 %v98_v46  ;;  %v109_v61 = vunpack.c.0.s8 %v99_v59  ;;  %v110_v62 = vunpack.c.1.s8 %v99_v59  ;;  %v951_v4 = vld [vmem:[#allocation6 + $0x18] sm:$0xff]  ;;  %v950_v5 = vld [vmem:[#allocation6 + $0x10] sm:$0xff]  ;;  %v948_v12 = vld [vmem:[#allocation6] sm:$0xff] }
  0x18   :  { %359 = vperm.xlu1 %1036, %v329_v7   ;;  %369 = vperm.xlu2 %1037, %v331_v32   ;;  %v121_v49 = vcvt.s32.f32 %v105_v47  ;;  %v122_v50 = vcvt.s32.f32 %v106_v48  ;;  %v947_v6 = vld [vmem:[%s1318_s2 + $0x38] sm:$0xff]  ;;  %v111_v7 = vunpack.c.2.s8 %v99_v59  ;;  %v938_v15 = vld [vmem:[%s1317_s1 + $0x30] sm:$0xff]  ;;  %v945_v16 = vld [vmem:[%s1318_s2 + $0x28] sm:$0xff] }
  0x19   :  { %v123_v55 = vcvt.s32.f32 %v107_v53  ;;  %v124_v56 = vcvt.s32.f32 %v108_v54  ;;  %v125_v0 = vcvt.s32.f32 %v109_v61  ;;  %v126_v1 = vcvt.s32.f32 %v110_v62  ;;  %671 = vmatpush.bf16.msra.mxu2 %v947_v6  ;;  %v944_v17 = vld [vmem:[%s1318_s2 + $0x20] sm:$0xff]  ;;  %v943_v18 = vld [vmem:[%s1318_s2 + $0x18] sm:$0xff]  ;;  %v942_v19 = vld [vmem:[%s1318_s2 + $0x10] sm:$0xff] }
  0x1a   :  { %v135_v51 = vpack.c.bf16 %v122_v50, %v121_v49  ;;  %575 = vmatpush.bf16.msra.mxu1 %v954_v60  ;;  %v940_v22 = vld [vmem:[%s1318_s2] sm:$0xff]  ;;  %v934_v39 = vld [vmem:[%s1317_s1 + $0x10] sm:$0xff]  ;;  %v935_v54 = vld [vmem:[%s1317_s1 + $0x18] sm:$0xff] }
  0x1b   :  { %208 = vmatpush.bf16.msra.mxu0 %v928_v8  ;;  %1006 = vmatpush.bf16.msra.mxu3 %v928_v8  ;;  %v136_v57 = vpack.c.bf16 %v124_v56, %v123_v55  ;;  %v137_v3 = vpack.c.bf16 %v126_v1, %v125_v0  ;;  %v112_v8 = vunpack.c.3.s8 %v99_v59  ;;  %v932_v23 = vld [vmem:[%s1317_s1] sm:$0xff] }
  0x1e   :  { %374 = vperm.xlu0 %1035, %v332_v10   ;;  %576 = vmatpush.bf16.msra.mxu1 %v953_v63  ;;  %v127_v10 = vcvt.s32.f32 %v111_v7 }
  0x1f   :  { %209 = vmatpush.bf16.msra.mxu0 %v927_v9  ;;  %1007 = vmatpush.bf16.msra.mxu3 %v927_v9  ;;  %v949_v9 = vld [vmem:[#allocation6 + $0x8] sm:$0xff] }
  0x20   :  { %379 = vperm.xlu1 %1036, %v333_v11   ;;  %384 = vperm.xlu2 %1037, %v334_v38   ;;  %v128_v11 = vcvt.s32.f32 %v112_v8  ;;  %v937_v8 = vld [vmem:[%s1317_s1 + $0x28] sm:$0xff] }
  0x22   :  { %577 = vmatpush.bf16.msra.mxu1 %v952_v2  ;;  %v138_v14 = vpack.c.bf16 %v128_v11, %v127_v10 }
  0x23   :  { %210 = vmatpush.bf16.msra.mxu0 %v926_v13  ;;  %1008 = vmatpush.bf16.msra.mxu3 %v926_v13  ;;  %v946_v13 = vld [vmem:[%s1318_s2 + $0x30] sm:$0xff] }
  0x24   :  { %672 = vmatpush.bf16.msra.mxu2 %v946_v13 }
  0x26   :  { %389 = vperm.xlu0 %1035, %v335_v21   ;;  %578 = vmatpush.bf16.msra.mxu1 %v951_v4  ;;  %v941_v21 = vld [vmem:[%s1318_s2 + $0x8] sm:$0xff] }
  0x27   :  { %211 = vmatpush.bf16.msra.mxu0 %v925_v20  ;;  %1009 = vmatpush.bf16.msra.mxu3 %v925_v20  ;;  %v939_v20 = vld [vmem:[%s1317_s1 + $0x38] sm:$0xff] }
  0x28   :  { %404 = vperm.xlu1 %1036, %v338_v26   ;;  %409 = vperm.xlu2 %1037, %v339_v45  }
  0x29   :  { %673 = vmatpush.bf16.msra.mxu2 %v945_v16 }
  0x2a   :  { %579 = vmatpush.bf16.msra.mxu1 %v950_v5 }
  0x2b   :  { %212 = vmatpush.bf16.msra.mxu0 %v924_v27  ;;  %1010 = vmatpush.bf16.msra.mxu3 %v924_v27 }
  0x2d   :  { %674 = vmatpush.bf16.msra.mxu2 %v944_v17 }
  0x2e   :  { %213 = vmatmul.bf16.vlgmr.msra.gmra.mxu0 %v133_v28  ;;  %243 = vmatmul.bf16.vlgmr.msra.gmra.mxu3 %v139_v29 }
  0x2f   :  { %394 = vperm.xlu0 %1035, %v336_v30   ;;  %1011 = vmatpush.bf16.msrb.mxu3 %v955_v58  ;;  %v933_v30 = vld [vmem:[%s1317_s1 + $0x8] sm:$0xff] }
  0x30   :  { %399 = vperm.xlu1 %1036, %v337_v31   ;;  %414 = vperm.xlu2 %1037, %v340_v52  }
  0x31   :  { %580 = vmatpush.bf16.msra.mxu1 %v949_v9  ;;  %675 = vmatpush.bf16.msra.mxu2 %v943_v18 }
  0x33   :  { %1012 = vmatpush.bf16.msrb.mxu3 %v954_v60 }
  0x35   :  { %581 = vmatpush.bf16.msra.mxu1 %v948_v12  ;;  %676 = vmatpush.bf16.msra.mxu2 %v942_v19 }
  0x37   :  { %419 = vperm.xlu0 %1035, %v341_v37   ;;  %1013 = vmatpush.bf16.msrb.mxu3 %v953_v63 }
  0x38   :  { %582 = vmatmul.bf16.vlgmr.msra.gmra.mxu1 %v932_v23 }
  0x39   :  { %677 = vmatpush.bf16.msra.mxu2 %v941_v21 }
  0x3b   :  { %1014 = vmatpush.bf16.msrb.mxu3 %v952_v2  ;;  %v936_v2 = vld [vmem:[%s1317_s1 + $0x20] sm:$0xff] }
  0x3d   :  { %678 = vmatpush.bf16.msra.mxu2 %v940_v22 }
  0x3e   :  { %218 = vmatmul.bf16.gmra.mxu0 %v134_v43  ;;  %248 = vmatmul.bf16.gmra.mxu3 %v140_v44 }
  0x3f   :  { %1015 = vmatpush.bf16.msrb.mxu3 %v951_v4 }
  0x43   :  { %1016 = vmatpush.bf16.msrb.mxu3 %v950_v5 }
  0x47   :  { %1017 = vmatpush.bf16.msrb.mxu3 %v949_v9 }
  0x48   :  { %587 = vmatmul.bf16.gmra.mxu1 %v933_v30 }
  0x4b   :  { %1018 = vmatpush.bf16.msrb.mxu3 %v948_v12 }
  0x4e   :  { %223 = vmatmul.bf16.gmra.mxu0 %v135_v51  ;;  %612 = vmatmul.bf16.vlgmr.msrb.gmra.mxu3 %v938_v15 }
  0x4f   :  { %1019 = vmatpush.bf16.msra.mxu3 %v947_v6 }
  0x53   :  { %1020 = vmatpush.bf16.msra.mxu3 %v946_v13 }
  0x57   :  { %1021 = vmatpush.bf16.msra.mxu3 %v945_v16 }
  0x58   :  { %592 = vmatmul.bf16.gmra.mxu1 %v934_v39 }
  0x5b   :  { %1022 = vmatpush.bf16.msra.mxu3 %v944_v17 }
  0x5e   :  { %228 = vmatmul.bf16.gmra.mxu0 %v136_v57  ;;  %617 = vmatmul.bf16.gmra.mxu3 %v939_v20 }
  0x5f   :  { %1023 = vmatpush.bf16.msra.mxu3 %v943_v18 }
  0x63   :  { %1024 = vmatpush.bf16.msra.mxu3 %v942_v19 }
  0x67   :  { %1025 = vmatpush.bf16.msra.mxu3 %v941_v21 }
  0x68   :  { %597 = vmatmul.bf16.gmra.mxu1 %v935_v54 }
  0x6a   :  { %v365_v26 = vpop.permute.xlu2 %364 }
  0x6b   :  { %1026 = vmatpush.bf16.msra.mxu3 %v940_v22 }
  0x6e   :  { %233 = vmatmul.bf16.gmra.mxu0 %v137_v3 }
  0x72   :  { %v370_v29 = vpop.permute.xlu2 %369 }
  0x78   :  { %602 = vmatmul.bf16.gmra.mxu1 %v936_v2 }
  0x7a   :  { %v385_v34 = vpop.permute.xlu2 %384 }
  0x7e   :  { %238 = vmatmul.bf16.gmra.mxu0 %v138_v14 }
  0x80   :  { %v345_v24 = vpop.permute.xlu0 %344 }
  0x82   :  { %v355_v25 = vpop.permute.xlu1 %354  ;;  %v410_v43 = vpop.permute.xlu2 %409 }
  0x88   :  { %v350_v27 = vpop.permute.xlu0 %349  ;;  %607 = vmatmul.bf16.gmra.mxu1 %v937_v8 }
  0x8a   :  { %v360_v28 = vpop.permute.xlu1 %359  ;;  %v415_v55 = vpop.permute.xlu2 %414 }
  0x90   :  { %v375_v31 = vpop.permute.xlu0 %374 }
  0x92   :  { %v380_v33 = vpop.permute.xlu1 %379 }
  0x98   :  { %v390_v40 = vpop.permute.xlu0 %389 }
  0x9a   :  { %v405_v42 = vpop.permute.xlu1 %404 }
  0xa1   :  { %v395_v49 = vpop.permute.xlu0 %394 }
  0xa2   :  { %v400_v16 = vpop.permute.xlu1 %399 }
  0xa9   :  { %v420_v58 = vpop.permute.xlu0 %419 }
  0xab   :  { %v214_v32 = vpop.f32.mrf.mxu0 }
  0xac   :  { %v422_v37 = vmul.f32 %v345_v24, %v214_v32 }
  0xb1   :  { %v244_v35 = vpop.f32.mrf.mxu3 }
  0xb2   :  { %v434_v44 = vmul.f32 %v405_v42, %v244_v35 }
  0xb3   :  { %v216_v36 = vpop.f32.mrf.mxu0 }
  0xb4   :  { %v423_v38 = vmul.f32 %v350_v27, %v216_v36 }
  0xb5   :  { %v583_v23 = vpop.f32.mrf.mxu1 }
  0xb6   :  { %v438_v41 = vpack.c.bf16 %v423_v38, %v422_v37 }
  0xb8   :  { %679 = vmatmul.bf16.vlgmr.msra.gmra.mxu2 %v438_v41 }
  0xb9   :  { %v246_v45 = vpop.f32.mrf.mxu3 }
  0xba   :  { %v435_v46 = vmul.f32 %v410_v43, %v246_v45 }
  0xbb   :  { %v219_v47 = vpop.f32.mrf.mxu0 }
  0xbc   :  { %v444_v48 = vpack.c.bf16 %v435_v46, %v434_v44  ;;  %v424_v52 = vmul.f32 %v355_v25, %v219_v47 }
  0xbd   :  { %v585_v25 = vpop.f32.mrf.mxu1 }
  0xbe   :  { %709 = vmatmul.bf16.vlgmr.msra.gmra.mxu3 %v444_v48 }
  0xc1   :  { %v249_v50 = vpop.f32.mrf.mxu3 }
  0xc2   :  { %v436_v57 = vmul.f32 %v415_v55, %v249_v50 }
  0xc3   :  { %v221_v51 = vpop.f32.mrf.mxu0 }
  0xc4   :  { %v425_v53 = vmul.f32 %v360_v28, %v221_v51 }
  0xc5   :  { %v588_v27 = vpop.f32.mrf.mxu1 }
  0xc6   :  { %v439_v56 = vpack.c.bf16 %v425_v53, %v424_v52 }
  0xc8   :  { %684 = vmatmul.bf16.gmra.mxu2 %v439_v56 }
  0xc9   :  { %v251_v59 = vpop.f32.mrf.mxu3 }
  0xca   :  { %v437_v60 = vmul.f32 %v420_v58, %v251_v59 }
  0xcb   :  { %v224_v61 = vpop.f32.mrf.mxu0 }
  0xcc   :  { %v445_v62 = vpack.c.bf16 %v437_v60, %v436_v57  ;;  %v426_v0 = vmul.f32 %v365_v26, %v224_v61 }
  0xce   :  { %714 = vmatmul.bf16.gmra.mxu3 %v445_v62 }
  0xd1   :  { %v613_v21 = vpop.f32.mrf.mxu3 }
  0xd3   :  { %v226_v63 = vpop.f32.mrf.mxu0 }
  0xd4   :  { %v427_v1 = vmul.f32 %v370_v29, %v226_v63 }
  0xd6   :  { %v440_v3 = vpack.c.bf16 %v427_v1, %v426_v0 }
  0xd8   :  { %689 = vmatmul.bf16.gmra.mxu2 %v440_v3 }
  0xd9   :  { %v615_v22 = vpop.f32.mrf.mxu3 }
  0xdb   :  { %v229_v4 = vpop.f32.mrf.mxu0 }
  0xdc   :  { %v428_v6 = vmul.f32 %v375_v31, %v229_v4  ;;  %v1292_v31 = vld [vmem:[%s1320_s4] ss:$0 sm:$0xff]  ;;  %s1124_s4 = smov [#allocation8]  }
  0xdd   :  { %s776_s15 = sshll.u32 %s1124_s4, 4  ;;  %s777_s15 = int_to_ptr.vmem [resolvable:$true] %s776_s15 }
  0xe1   :  { %v618_v24 = vpop.f32.mrf.mxu3 }
  0xe3   :  { %v231_v5 = vpop.f32.mrf.mxu0 }
  0xe4   :  { %v429_v7 = vmul.f32 %v380_v33, %v231_v5  ;;  %v590_v33 = vpop.f32.mrf.mxu1 }
  0xe6   :  { %v441_v9 = vpack.c.bf16 %v429_v7, %v428_v6 }
  0xe8   :  { %694 = vmatmul.bf16.gmra.mxu2 %v441_v9 }
  0xe9   :  { %v620_v26 = vpop.f32.mrf.mxu3 }
  0xeb   :  { %v234_v10 = vpop.f32.mrf.mxu0 }
  0xec   :  { %v430_v12 = vmul.f32 %v385_v34, %v234_v10  ;;  %v593_v44 = vpop.f32.mrf.mxu1 }
  0xf3   :  { %v236_v11 = vpop.f32.mrf.mxu0 }
  0xf4   :  { %v431_v13 = vmul.f32 %v390_v40, %v236_v11  ;;  %v595_v52 = vpop.f32.mrf.mxu1 }
  0xf6   :  { %v442_v14 = vpack.c.bf16 %v431_v13, %v430_v12 }
  0xf8   :  { %699 = vmatmul.bf16.gmra.mxu2 %v442_v14 }
  0xfb   :  { %v239_v15 = vpop.f32.mrf.mxu0 }
  0xfc   :  { %v432_v18 = vmul.f32 %v395_v49, %v239_v15  ;;  %v598_v61 = vpop.f32.mrf.mxu1 }
 0x103   :  { %v241_v17 = vpop.f32.mrf.mxu0 }
 0x104   :  { %v433_v19 = vmul.f32 %v400_v16, %v241_v17  ;;  %v600_v4 = vpop.f32.mrf.mxu1 }
 0x106   :  { %v443_v20 = vpack.c.bf16 %v433_v19, %v432_v18 }
 0x108   :  { %704 = vmatmul.bf16.gmra.mxu2 %v443_v20 }
 0x10c   :  { %v603_v9 = vpop.f32.mrf.mxu1 }
 0x114   :  { %v605_v14 = vpop.f32.mrf.mxu1 }
 0x13b   :  { %v680_v28 = vpop.f32.mrf.mxu2 }
 0x13c   :  { %v681_v30 = vadd.f32 %v680_v28, %v583_v23 }
 0x13e   :  { %v724_v35 = vadd.f32 %v1292_v31, %v681_v30 }
 0x141   :  { %v710_v29 = vpop.f32.mrf.mxu3 }
 0x142   :  { %v711_v37 = vadd.f32 %v710_v29, %v613_v21  ;;  %v608_v21 = vpop.f32.mrf.mxu1 }
 0x143   :  { %v682_v32 = vpop.f32.mrf.mxu2 }
 0x144   :  { %v683_v34 = vadd.f32 %v682_v32, %v585_v25  ;;  %v736_v42 = vadd.f32 %v1292_v31, %v711_v37 }
 0x146   :  { %v725_v36 = vadd.f32 %v1292_v31, %v683_v34 }
 0x148   :  { %v959_v38 = vpack.c.bf16 %v725_v36, %v724_v35 }
 0x149   :  { %v712_v39 = vpop.f32.mrf.mxu3 }
 0x14a   :  { %960 = vst [vmem:[#allocation8] sm:$0xff] %v959_v38   ;;  %v713_v40 = vadd.f32 %v712_v39, %v615_v22 }
 0x14b   :  { %v685_v41 = vpop.f32.mrf.mxu2 }
 0x14c   :  { %v737_v43 = vadd.f32 %v1292_v31, %v713_v40  ;;  %v686_v47 = vadd.f32 %v685_v41, %v588_v27 }
 0x14e   :  { %v989_v45 = vpack.c.bf16 %v737_v43, %v736_v42  ;;  %v726_v50 = vadd.f32 %v1292_v31, %v686_v47 }
 0x150   :  { %1001 = vst [vmem:[#allocation8 + $0x30] sm:$0xff] %v989_v45  }
 0x151   :  { %v715_v46 = vpop.f32.mrf.mxu3 }
 0x152   :  { %v716_v53 = vadd.f32 %v715_v46, %v618_v24  ;;  %v610_v24 = vpop.f32.mrf.mxu1 }
 0x153   :  { %v687_v48 = vpop.f32.mrf.mxu2 }
 0x154   :  { %v688_v49 = vadd.f32 %v687_v48, %v590_v33  ;;  %v738_v58 = vadd.f32 %v1292_v31, %v716_v53 }
 0x156   :  { %v727_v51 = vadd.f32 %v1292_v31, %v688_v49 }
 0x158   :  { %v964_v54 = vpack.c.bf16 %v727_v51, %v726_v50 }
 0x159   :  { %v717_v55 = vpop.f32.mrf.mxu3 }
 0x15a   :  { %996 = vst [vmem:[#allocation8 + $0x8] sm:$0xff] %v964_v54   ;;  %v718_v56 = vadd.f32 %v717_v55, %v620_v26 }
 0x15b   :  { %v690_v57 = vpop.f32.mrf.mxu2 }
 0x15c   :  { %v739_v59 = vadd.f32 %v1292_v31, %v718_v56  ;;  %v691_v62 = vadd.f32 %v690_v57, %v593_v44 }
 0x15e   :  { %v994_v60 = vpack.c.bf16 %v739_v59, %v738_v58  ;;  %v728_v1 = vadd.f32 %v1292_v31, %v691_v62 }
 0x160   :  { %1002 = vst [vmem:[#allocation8 + $0x38] sm:$0xff] %v994_v60  }
 0x163   :  { %v692_v63 = vpop.f32.mrf.mxu2 }
 0x164   :  { %v693_v0 = vadd.f32 %v692_v63, %v595_v52 }
 0x166   :  { %v729_v2 = vadd.f32 %v1292_v31, %v693_v0 }
 0x168   :  { %v969_v3 = vpack.c.bf16 %v729_v2, %v728_v1 }
 0x16a   :  { %997 = vst [vmem:[#allocation8 + $0x10] sm:$0xff] %v969_v3  }
 0x16b   :  { %v695_v5 = vpop.f32.mrf.mxu2 }
 0x16c   :  { %v696_v6 = vadd.f32 %v695_v5, %v598_v61 }
 0x16e   :  { %v730_v10 = vadd.f32 %v1292_v31, %v696_v6 }
 0x173   :  { %v697_v7 = vpop.f32.mrf.mxu2 }
 0x174   :  { %v698_v8 = vadd.f32 %v697_v7, %v600_v4 }
 0x176   :  { %v731_v11 = vadd.f32 %v1292_v31, %v698_v8 }
 0x178   :  { %v974_v12 = vpack.c.bf16 %v731_v11, %v730_v10 }
 0x17a   :  { %998 = vst [vmem:[#allocation8 + $0x18] sm:$0xff] %v974_v12  }
 0x17b   :  { %v700_v13 = vpop.f32.mrf.mxu2 }
 0x17c   :  { %v701_v15 = vadd.f32 %v700_v13, %v603_v9 }
 0x17e   :  { %v732_v18 = vadd.f32 %v1292_v31, %v701_v15 }
 0x183   :  { %v702_v16 = vpop.f32.mrf.mxu2 }
 0x184   :  { %v703_v17 = vadd.f32 %v702_v16, %v605_v14 }
 0x186   :  { %v733_v19 = vadd.f32 %v1292_v31, %v703_v17 }
 0x188   :  { %v979_v20 = vpack.c.bf16 %v733_v19, %v732_v18 }
 0x18a   :  { %999 = vst [vmem:[#allocation8 + $0x20] sm:$0xff] %v979_v20  }
 0x18b   :  { %v705_v22 = vpop.f32.mrf.mxu2 }
 0x18c   :  { %v706_v23 = vadd.f32 %v705_v22, %v608_v21 }
 0x18e   :  { %v734_v27 = vadd.f32 %v1292_v31, %v706_v23 }
 0x193   :  { %v707_v25 = vpop.f32.mrf.mxu2 }
 0x194   :  { %v708_v26 = vadd.f32 %v707_v25, %v610_v24 }
 0x196   :  { %v735_v28 = vadd.f32 %v1292_v31, %v708_v26 }
 0x198   :  { %v984_v29 = vpack.c.bf16 %v735_v28, %v734_v27 }
 0x19a   :  { %1000 = vst [vmem:[#allocation8 + $0x28] sm:$0xff] %v984_v29  }
 0x19b   :  { %784 = dma.vmem_to_hbm [thread:$0]  %s777_s15, 1024, %s779_s18, [#allocation5], %s1121_s9, %s1121_s9, %s1122_s10  }
 0x19c   :  { %1115 = dma.done.wait [#allocation5], 1024  }
 0x19d   :  { %1116 = vsyncadd [#allocation5], 4294966272 }
 0x19e   :  { %789 = vsyncpa [#allocation4], 1 }
 0x19f   :  { %790 = vsyncpa [#allocation7], 1 }
 0x1a0   :  { %791 = vsyncpa [#allocation5], 1 }

</bundles_post_ra>
